<compile_context>
chip_gen: v7x
topology: tpu7x:2x2x1
jax: 0.10.0
libtpu: 0.0.40
codegen_flags: <defaults>
</compile_context>

<pallas_src>
import jax
import jax.numpy as jnp
from jax.experimental import pallas as pl
from jax.experimental.pallas import tpu as pltpu


# --------------------------------------------------------------------------- #
# Kernel
# --------------------------------------------------------------------------- #
def _attention_kernel(x_ref, w1t_ref, b1_ref, w2_ref, o_ref):
    """One packed batch tile of the attention forward pass.

    x_ref:   (TB, S, H)  f32   packed tile of lstm_out
    w1t_ref: (H, H)      bf16  first Linear weight, pre-transposed to (in, out)
    b1_ref:  (1, H)      f32   first Linear bias
    w2_ref:  (1, H)      f32   second Linear weight row (out_features == 1)
    o_ref:   (TB, H)           context vectors
    """
    TB, S, H = x_ref.shape

    x = x_ref[...]                                    # (TB, S, H) f32
    # Merge batch/seq into the MXU M dim.  Free view when S % 8 == 0; for
    # odd S the compiler inserts a per-step relayout copy (acceptable here).
    x2d = x.reshape(TB * S, H)

    # ---- Linear(H->H) + tanh ------------------------------------------------
    # Single-pass bf16 MXU matmul with f32 accumulation; bias add and tanh stay
    # f32 (v5e's VPU/EUP have no bf16).  tanh goes to the EUP slot.
    h = jnp.tanh(
        jnp.dot(x2d.astype(jnp.bfloat16), w1t_ref[...],
                preferred_element_type=jnp.float32)
        + b1_ref[...]
    )                                                 # (TB*S, H) f32

    # ---- Linear(H->1), kept OFF the MXU -------------------------------------
    # An N=1 matmul would be padded to 128/256 output lanes and cost as much as
    # Linear1; a VPU multiply + XLU lane reduce is essentially free.  The +b2
    # bias is a constant shift of every score, which softmax over the sequence
    # ignores, so it is dropped entirely.
    scores = jnp.sum(h * w2_ref[...], axis=-1, keepdims=True)    # (TB*S, 1)

    # ---- numerically stable softmax over the sequence axis ------------------
    s3 = scores.reshape(TB, S, 1)
    m = jnp.max(s3, axis=1, keepdims=True)            # (TB, 1, 1) per-batch max
    e = jnp.exp(s3 - m)                               # (TB, S, 1) unnormalized

    # ---- weighted sum over the sequence (XLU sublane reduces) ---------------
    num = jnp.sum(x * e, axis=1)                      # (TB, H)
    den = jnp.sum(e, axis=1)                          # (TB, 1)

    # EUP approximate reciprocal + one Newton step: f32-accurate normalizer
    # without touching the VALU divide path.
    inv = pl.reciprocal(den, approx=True)
    inv = inv * (2.0 - den * inv)
    o_ref[...] = (num * inv).astype(o_ref.dtype)


# --------------------------------------------------------------------------- #
# Tiling / VMEM heuristics
# --------------------------------------------------------------------------- #
def _vmem_capacity_bytes():
    try:
        return int(pltpu.get_tpu_info().vmem_capacity_bytes)
    except Exception:
        return 64 << 20          # conservative (v7x-sized) fallback


def _const_spec(shape):
    """Grid-invariant VMEM block; single-buffered when this JAX supports it."""
    index_map = lambda i: (0,) * len(shape)
    try:
        return pl.BlockSpec(shape, index_map, pipeline_mode=pl.Buffered(1))
    except (TypeError, AttributeError):
        return pl.BlockSpec(shape, index_map)


def _choose_tb(B, S, H):
    """Pick the batch tile TB and the padded batch size.

    Targets a multi-MiB input slab per grid step (HBM roofline / per-step
    overhead amortization) under a generation-aware VMEM budget that counts
    the double-buffered input, the live f32 temporaries and the weights.
    Prefers a TB that divides B (no wrapper-side batch-pad copy), keeps TB
    sublane-aligned, and keeps >=2 grid steps for large batches (v7x dual-TC).
    """
    row_bytes = S * H * 4                              # one batch row of x (f32)
    cap = _vmem_capacity_bytes()
    budget = min(int(cap * 0.6), 80 << 20)             # working-set budget
    weight_bytes = H * H * 2 + 4 * H * 4               # bf16 w1^T + f32 b1/w2 rows
    avail = max(budget - weight_bytes, row_bytes)
    # Per step: 2x double-buffered input slab + ~3 live f32 temporaries of the
    # same size (h, x*e, bf16 casts) + small outputs  ->  ~6 slabs.
    tb = max(1, avail // (6 * row_bytes))
    tb = min(tb, max(1, (8 << 20) // row_bytes))       # <= ~8 MiB input slab
    tb = min(tb, B)
    if B >= 16:
        tb = min(tb, B // 2)                           # >=2 grid steps (v7x)
    if tb >= B:
        return B, B                                    # one step spans the batch

    # TODO(synk): sequence-tiled variant for the extreme case where even an
    # 8-row slab (8*S*H*4 bytes) exceeds the VMEM budget.
    tb = max(tb, min(8, B))

    # Prefer a sublane-aligned divisor of B: no batch-pad HBM copy at all.
    for cand in range(min(tb, B - 1), 7, -1):
        if cand % 8 == 0 and B % cand == 0:
            if cand >= max(8, tb // 2):
                return cand, B
            break

    # Fall back: near-even, sublane-aligned tiles over a lightly padded batch.
    steps = (B + tb - 1) // tb
    per_step = (B + steps - 1) // steps
    tb8 = ((per_step + 7) // 8) * 8
    return tb8, tb8 * steps


# --------------------------------------------------------------------------- #
# Wrapper
# --------------------------------------------------------------------------- #
def attention_forward(lstm_out, w1, b1, w2, b2):
    """lstm_out: (B, S, H) f32.
    w1: (H, H)  PyTorch Linear weight (out, in);  b1: (H,)
    w2: (1, H)  PyTorch Linear weight (out=1, in=H);  b2: (1,)
    Returns context: (B, H)
    """
    B, S, H = lstm_out.shape
    TB, B_pad = _choose_tb(B, S, H)

    # Pre-transpose + pre-cast the matmul weight to bf16 (single MXU pass,
    # half the weight DMA).  Biases / w2 row stay f32 for the VPU math.
    w1t = jnp.transpose(w1).astype(jnp.bfloat16)       # (in, out)
    b1r = b1.reshape(1, H).astype(jnp.float32)
    w2r = w2.reshape(1, H).astype(jnp.float32)
    # b2 is mathematically a no-op: softmax over the sequence is invariant to a
    # constant shift of the scores, so the Linear(H->1) bias never reaches the
    # output.  It is intentionally not passed into the kernel.
    del b2

    x = lstm_out
    if B_pad != B:
        # Zero pad-batches are safe: their softmax is uniform (denominator S,
        # never 0) and their context is exactly 0; they are sliced away below.
        x = jnp.pad(x, ((0, B_pad - B), (0, 0), (0, 0)))

    cap = _vmem_capacity_bytes()
    vmem_limit = max(32 << 20, min(int(cap * 0.85), 100 << 20))

    out = pl.pallas_call(
        _attention_kernel,
        out_shape=jax.ShapeDtypeStruct((B_pad, H), lstm_out.dtype),
        grid_spec=pltpu.PrefetchScalarGridSpec(
            num_scalar_prefetch=0,
            grid=(B_pad // TB,),
            in_specs=[
                pl.BlockSpec((TB, S, H), lambda i: (i, 0, 0)),   # packed lstm_out
                _const_spec((H, H)),                             # w1^T (bf16, invariant)
                _const_spec((1, H)),                             # b1
                _const_spec((1, H)),                             # w2 row
            ],
            out_specs=pl.BlockSpec((TB, H), lambda i: (i, 0)),
        ),
        compiler_params=pltpu.CompilerParams(
            dimension_semantics=("parallel",),
            vmem_limit_bytes=vmem_limit,
        ),
    )(x, w1t, b1r, w2r)

    return out[:B]


# --------------------------------------------------------------------------- #
# Reference + test
# --------------------------------------------------------------------------- #
def _reference(lstm_out, w1, b1, w2, b2):
    # Pure-JAX reference mirroring the PyTorch forward exactly (full f32).
    hi = jax.lax.Precision.HIGHEST
    h = jnp.tanh(jnp.einsum("bsh,oh->bso", lstm_out, w1, precision=hi) + b1)
    scores = jnp.einsum("bsh,oh->bso", h, w2, precision=hi) + b2
    attn_w = jax.nn.softmax(scores, axis=1)            # softmax over the sequence
    return jnp.sum(attn_w * lstm_out, axis=1)          # (B, H)


if __name__ == "__main__":
    B, S, H = 2, 8, 32
    key = jax.random.PRNGKey(0)
    k_x, k_w1, k_b1, k_w2, k_b2 = jax.random.split(key, 5)

    lstm_out = jax.random.normal(k_x, (B, S, H), dtype=jnp.float32)
    # Deterministic synthetic parameters (PyTorch Linear shapes: (out, in)).
    bound1 = 1.0 / jnp.sqrt(H)
    w1 = jax.random.uniform(k_w1, (H, H), jnp.float32, -bound1, bound1)
    b1 = jax.random.uniform(k_b1, (H,), jnp.float32, -bound1, bound1)
    w2 = jax.random.uniform(k_w2, (1, H), jnp.float32, -bound1, bound1)
    b2 = jax.random.uniform(k_b2, (1,), jnp.float32, -bound1, bound1)

    ctx = jax.jit(attention_forward)(lstm_out, w1, b1, w2, b2)
    jax.block_until_ready(ctx)

    ref = _reference(lstm_out, w1, b1, w2, b2)
    assert ctx.shape == (B, H)
    # Tolerance covers the bf16 Linear1 matmul (softmax/weighted-sum stay f32)
    # and the approx-reciprocal (+Newton) normalizer.
    assert jnp.allclose(ctx, ref, atol=1e-2, rtol=1e-2), float(
        jnp.max(jnp.abs(ctx - ref)))

    print("KERNEL_OK")
</pallas_src>

<mosaic_0001>
module attributes {stable_mosaic.version = 11 : i64} {
  func.func @_attention_kernel(%arg0: i32, %arg1: memref<2x8x32xf32, #tpu.memory_space<vmem>>, %arg2: memref<32x32xbf16, #tpu.memory_space<vmem>>, %arg3: memref<1x32xf32, #tpu.memory_space<vmem>>, %arg4: memref<1x32xf32, #tpu.memory_space<vmem>>, %arg5: memref<2x32xf32, #tpu.memory_space<vmem>>) attributes {dimension_semantics = [#tpu.dimension_semantics<parallel>], iteration_bounds = array<i64: 1>, scalar_prefetch = 0 : i64, scratch_operands = 0 : i64, tpu.core_type = #tpu.core_type<tc>, window_params = [{transform_indices = @transform_0, window_bounds = array<i64: 2, 8, 32>}, {pipeline_mode = #tpu.pipeline_mode<synchronous>, transform_indices = @transform_1, window_bounds = array<i64: 32, 32>}, {pipeline_mode = #tpu.pipeline_mode<synchronous>, transform_indices = @transform_2, window_bounds = array<i64: 1, 32>}, {pipeline_mode = #tpu.pipeline_mode<synchronous>, transform_indices = @transform_3, window_bounds = array<i64: 1, 32>}, {transform_indices = @transform_4, window_bounds = array<i64: 2, 32>}]} {
    %c0 = arith.constant 0 : index
    %c0_0 = arith.constant 0 : index
    %c0_1 = arith.constant 0 : index
    %0 = vector.load %arg1[%c0, %c0_0, %c0_1] : memref<2x8x32xf32, #tpu.memory_space<vmem>>, vector<2x8x32xf32>
    %1 = vector.shape_cast %0 : vector<2x8x32xf32> to vector<16x32xf32>
    %2 = arith.truncf %1 : vector<16x32xf32> to vector<16x32xbf16>
    %c0_2 = arith.constant 0 : index
    %c0_3 = arith.constant 0 : index
    %3 = vector.load %arg2[%c0_2, %c0_3] : memref<32x32xbf16, #tpu.memory_space<vmem>>, vector<32x32xbf16>
    %cst = arith.constant dense<0.000000e+00> : vector<16x32xf32>
    %4 = tpu.matmul %2, %3, %cst {dimension_numbers = #tpu.dot_dimension_numbers<[1], [0], [0], [1], [0, 0, 1, 1], [], []>} : vector<16x32xbf16>, vector<32x32xbf16>, vector<16x32xf32> -> vector<16x32xf32>
    %c0_4 = arith.constant 0 : index
    %c0_5 = arith.constant 0 : index
    %5 = vector.load %arg3[%c0_4, %c0_5] : memref<1x32xf32, #tpu.memory_space<vmem>>, vector<1x32xf32>
    %6 = vector.broadcast %5 : vector<1x32xf32> to vector<16x32xf32>
    %7 = arith.addf %4, %6 : vector<16x32xf32>
    %8 = math.tanh %7 : vector<16x32xf32>
    %c0_6 = arith.constant 0 : index
    %c0_7 = arith.constant 0 : index
    %9 = vector.load %arg4[%c0_6, %c0_7] : memref<1x32xf32, #tpu.memory_space<vmem>>, vector<1x32xf32>
    %10 = vector.broadcast %9 : vector<1x32xf32> to vector<16x32xf32>
    %11 = arith.mulf %8, %10 : vector<16x32xf32>
    %cst_8 = arith.constant dense<0.000000e+00> : vector<16xf32>
    %12 = vector.multi_reduction <add>, %11, %cst_8 [1] : vector<16x32xf32> to vector<16xf32>
    %13 = vector.shape_cast %12 : vector<16xf32> to vector<16x1xf32>
    %14 = vector.shape_cast %13 : vector<16x1xf32> to vector<2x8x1xf32>
    %cst_9 = arith.constant dense<0xFF800000> : vector<2x1xf32>
    %15 = vector.multi_reduction <maximumf>, %14, %cst_9 [1] : vector<2x8x1xf32> to vector<2x1xf32>
    %16 = vector.shape_cast %15 : vector<2x1xf32> to vector<2x1x1xf32>
    %17 = vector.broadcast %16 : vector<2x1x1xf32> to vector<2x8x1xf32>
    %18 = arith.subf %14, %17 : vector<2x8x1xf32>
    %19 = math.exp %18 : vector<2x8x1xf32>
    %20 = vector.broadcast %19 : vector<2x8x1xf32> to vector<2x8x32xf32>
    %21 = arith.mulf %0, %20 : vector<2x8x32xf32>
    %cst_10 = arith.constant dense<0.000000e+00> : vector<2x32xf32>
    %22 = vector.multi_reduction <add>, %21, %cst_10 [1] : vector<2x8x32xf32> to vector<2x32xf32>
    %cst_11 = arith.constant dense<0.000000e+00> : vector<2x1xf32>
    %23 = vector.multi_reduction <add>, %19, %cst_11 [1] : vector<2x8x1xf32> to vector<2x1xf32>
    %24 = tpu.reciprocal %23 {approx = true} : vector<2x1xf32> -> vector<2x1xf32>
    %25 = arith.mulf %23, %24 : vector<2x1xf32>
    %cst_12 = arith.constant 2.000000e+00 : f32
    %26 = vector.broadcast %cst_12 : f32 to vector<2x1xf32>
    %27 = arith.subf %26, %25 : vector<2x1xf32>
    %28 = arith.mulf %24, %27 : vector<2x1xf32>
    %29 = vector.broadcast %28 : vector<2x1xf32> to vector<2x32xf32>
    %30 = arith.mulf %22, %29 : vector<2x32xf32>
    %c0_13 = arith.constant 0 : index
    %c0_14 = arith.constant 0 : index
    %31 = vector.load %arg5[%c0_13, %c0_14] : memref<2x32xf32, #tpu.memory_space<vmem>>, vector<2x32xf32>
    tpu.vector_store %arg5[%c0_13, %c0_14], %30 {strides = array<i32>} : memref<2x32xf32, #tpu.memory_space<vmem>>, vector<2x32xf32>,
    return
  }
  func.func @transform_0(%arg0: i32) -> (i32, i32, i32) {
    %c0_i32 = arith.constant 0 : i32
    %c0_i32_0 = arith.constant 0 : i32
    %c0_i32_1 = arith.constant 0 : i32
    return %arg0, %c0_i32, %c0_i32_0 : i32, i32, i32
  }
  func.func @transform_1(%arg0: i32) -> (i32, i32) {
    %c0_i32 = arith.constant 0 : i32
    %c0_i32_0 = arith.constant 0 : i32
    %c0_i32_1 = arith.constant 0 : i32
    return %c0_i32, %c0_i32_0 : i32, i32
  }
  func.func @transform_2(%arg0: i32) -> (i32, i32) {
    %c0_i32 = arith.constant 0 : i32
    %c0_i32_0 = arith.constant 0 : i32
    %c0_i32_1 = arith.constant 0 : i32
    return %c0_i32, %c0_i32_0 : i32, i32
  }
  func.func @transform_3(%arg0: i32) -> (i32, i32) {
    %c0_i32 = arith.constant 0 : i32
    %c0_i32_0 = arith.constant 0 : i32
    %c0_i32_1 = arith.constant 0 : i32
    return %c0_i32, %c0_i32_0 : i32, i32
  }
  func.func @transform_4(%arg0: i32) -> (i32, i32) {
    %c0_i32 = arith.constant 0 : i32
    %c0_i32_0 = arith.constant 0 : i32
    return %arg0, %c0_i32 : i32, i32
  }
}

</mosaic_0001>

<bundles_post_ra>
// kernel: attention_forward.1
= control target key start
LH: loop header
LB: loop body
LE: loop exit
PB: predicated region body
PF: predicated region fallthrough
CT: control target
= control target key end

     0   :  { %v241_v1 = vmov 0.0   ;;  %vm242_vm0 = vmmov 0   ;;  %s304_s0 = inlined_call_operand.vmem [shape: f32[2,8,32], index: 0, kind: input, shape index: {}]   ;;  %s305_s1 = inlined_call_operand.vmem [shape: bf16[32,32], index: 1, kind: input, shape index: {}]   ;;  %s306_s2 = inlined_call_operand.vmem [shape: f32[1,32], index: 2, kind: input, shape index: {}]   ;;  %s307_s3 = inlined_call_operand.vmem [shape: f32[1,32], index: 3, kind: input, shape index: {}]   ;;  %s308_s4 = inlined_call_operand.hbm [shape: f32[2,32], index: 4, kind: output, shape index: {}]  }
   0x1   :  { %v203_v0 = vld [vmem:[%s305_s1] sm:$0xff]   ;;  %192 = vmatprep.subr.bf16.mxu0 %v241_v1  ;;  %v204_v2 = vld [vmem:[%s305_s1 + $0x8] sm:$0xff]   ;;  %196 = vmatprep.mubr.msk.bf16.mxu0 %vm242_vm0, %v241_v1 }
   0x2   :  { %193 = vmatpush3.bf16.msra.mxu0 %v203_v0  ;;  %v19_v3 = vld [vmem:[%s304_s0] sm:$0xff]  ;;  %v20_v4 = vld [vmem:[%s304_s0 + $0x8] sm:$0xff] }
   0x3   :  { %194 = vmatprep.subr.bf16.mxu0 %v241_v1 }
   0x4   :  { %9 = vsyncpa [#allocation3], 0  ;;  %v21_v5 = vpack.c.bf16 %v20_v4, %v19_v3  ;;  %vm45_vm1 = vcmask 261120   ;;  %v184_v6 = vld [vmem:[%s306_s2] ss:$0 sm:$0xff]  ;;  %s243_s2 = smov [#allocation2]  }
   0x5   :  { %v188_v13 = vld [vmem:[%s307_s3] ss:$0 sm:$0xff]  ;;  %s176_s3 = sshll.u32 %s243_s2, 4  ;;  %vm165_vm2 = vcmask 1041409   ;;  %vm168_vm3 = vcmask 254976   ;;  %s177_s3 = int_to_ptr.vmem [resolvable:$true] %s176_s3 }
   0x6   :  { %195 = vmatpush3.bf16.msra.mxu0 %v204_v2  ;;  %s217_s25 = scalar_lea.vmem %s177_s3, 32  ;;  %p222_p1 = scmp.lt.s32.totalorder %s177_s3, %s177_s3 }
   0x7   :  { %p218_p0 = scmp.ne.s32.totalorder %s177_s3, %s217_s25  ;;  %p223_p2 = scmp.lt.s32.totalorder %s217_s25, %s217_s25 }
   0x9   :  { %197 = vmatmul.mubr.msk.bf16.vlgmr.msra.gmra.mrb[0].mxu0 %vm45_vm1, %v21_v5  ;;  %p224_p3 = por %p223_p2, %p222_p1 }
   0xb   :  { %p225_p4 = pnand %p224_p3, %p218_p0 }
  0xdc   :  { %v83_v7 = vpop.f32.mrb[0].mxu0 }
  0xdd   :  { %v84_v8 = vadd.f32 %v184_v6, %v83_v7  ;;  %v198_v9 = vpop.f32.mrb[1].mxu0 }
  0xde   :  { %v86_v10 = vpop.f32.mrb[2].mxu0 }
  0xdf   :  { %205 = vtanh.f32 %v84_v8  ;;  %v87_v11 = vadd.f32 %v184_v6, %v86_v10  ;;  %v199_v12 = vpop.f32.mrb[3].mxu0 }
  0xe1   :  { %207 = vtanh.f32 %v87_v11 }
  0xe9   :  { %v206_v14 = vpop.eup %205 }
  0xea   :  { %v99_v15 = vmul.f32 %v206_v14, %v188_v13 }
  0xeb   :  { %v208_v16 = vpop.eup %207 }
  0xec   :  { %v101_v17 = vsel %vm45_vm1, %v99_v15, 0.0  ;;  %v100_v18 = vmul.f32 %v208_v16, %v188_v13 }
  0xed   :  { %102 = vadd.xlane.f32.xlu0 %v101_v17 }
  0xee   :  { %v104_v19 = vsel %vm45_vm1, %v100_v18, 0.0 }
  0xf1   :  { %105 = vadd.xlane.f32.xlu0 %v104_v19 }
 0x17a   :  { %v103_v20 = vpop.xlane.xlu0 %102 }
 0x17b   :  { %v107_v21 = vrot.slane %v103_v20, 4 }
 0x17d   :  { %v108_v22 = vmax.f32 %v103_v20, %v107_v21 }
 0x17e   :  { %v106_v23 = vpop.xlane.xlu0 %105 }
 0x17f   :  { %v109_v24 = vrot.slane %v108_v22, 2  ;;  %v113_v25 = vrot.slane %v106_v23, 4 }
 0x181   :  { %v110_v26 = vmax.f32 %v108_v22, %v109_v24  ;;  %v114_v27 = vmax.f32 %v106_v23, %v113_v25 }
 0x183   :  { %v111_v28 = vrot.slane %v110_v26, 1  ;;  %v115_v29 = vrot.slane %v114_v27, 2 }
 0x185   :  { %v112_v30 = vmax.f32 %v110_v26, %v111_v28  ;;  %v116_v31 = vmax.f32 %v114_v27, %v115_v29 }
 0x187   :  { %v119_v32 = vsub.f32 %v103_v20, %v112_v30  ;;  %v117_v33 = vrot.slane %v116_v31, 1 }
 0x189   :  { %v121_v34 = vmul.f32 1.442695, %v119_v32  ;;  %v118_v35 = vmax.f32 %v116_v31, %v117_v33 }
 0x18b   :  { %209 = vpow2.f32 %v121_v34  ;;  %v120_v36 = vsub.f32 %v106_v23, %v118_v35 }
 0x18d   :  { %v123_v37 = vmul.f32 1.442695, %v120_v36 }
 0x18f   :  { %211 = vpow2.f32 %v123_v37 }
 0x195   :  { %v210_v38 = vpop.eup %209 }
 0x196   :  { %v141_v39 = vrot.slane %v210_v38, 4  ;;  %v125_v42 = vmul.f32 %v210_v38, %v19_v3 }
 0x198   :  { %v142_v40 = vadd.f32 %v210_v38, %v141_v39  ;;  %v127_v48 = vsel %vm45_vm1, %v125_v42, 0.0 }
 0x199   :  { %v212_v41 = vpop.eup %211  ;;  %v128_v54 = vrot.slane %v127_v48, 4 }
 0x19a   :  { %v126_v43 = vmul.f32 %v212_v41, %v20_v4  ;;  %v143_v44 = vrot.slane %v142_v40, 2  ;;  %v147_v45 = vrot.slane %v212_v41, 4 }
 0x19b   :  { %v129_v58 = vadd.f32 %v128_v54, %v127_v48 }
 0x19c   :  { %v144_v46 = vadd.f32 %v143_v44, %v142_v40  ;;  %v148_v47 = vadd.f32 %v212_v41, %v147_v45  ;;  %v134_v49 = vsel %vm45_vm1, %v126_v43, 0.0 }
 0x19d   :  { %v135_v55 = vrot.slane %v134_v49, 4  ;;  %v130_v60 = vrot.slane %v129_v58, 2 }
 0x19e   :  { %v145_v50 = vrot.slane %v144_v46, 1  ;;  %v149_v51 = vrot.slane %v148_v47, 2 }
 0x19f   :  { %v136_v59 = vadd.f32 %v135_v55, %v134_v49  ;;  %v131_v63 = vadd.f32 %v130_v60, %v129_v58 }
 0x1a0   :  { %v146_v52 = vadd.f32 %v145_v50, %v144_v46  ;;  %v150_v53 = vadd.f32 %v149_v51, %v148_v47 }
 0x1a1   :  { %v137_v61 = vrot.slane %v136_v59, 2  ;;  %v132_v4 = vrot.slane %v131_v63, 1 }
 0x1a2   :  { %v151_v56 = vrot.slane %v150_v53, 1  ;;  %213 = vrcp.f32 %v146_v52 }
 0x1a3   :  { %v138_v0 = vadd.f32 %v137_v61, %v136_v59  ;;  %v133_v9 = vadd.f32 %v132_v4, %v131_v63 }
 0x1a4   :  { %v152_v57 = vadd.f32 %v151_v56, %v150_v53 }
 0x1a5   :  { %v139_v5 = vrot.slane %v138_v0, 1 }
 0x1a6   :  { %215 = vrcp.f32 %v152_v57 }
 0x1a7   :  { %v140_v10 = vadd.f32 %v139_v5, %v138_v0 }
 0x1ac   :  { %v214_v62 = vpop.eup %213 }
 0x1ad   :  { %v155_v1 = vmul.f32 %v214_v62, %v146_v52 }
 0x1af   :  { %v157_v2 = vsub.f32 2.0, %v155_v1 }
 0x1b0   :  { %v216_v3 = vpop.eup %215 }
 0x1b1   :  { %v156_v6 = vmul.f32 %v216_v3, %v152_v57  ;;  %v159_v8 = vmul.f32 %v214_v62, %v157_v2 }
 0x1b3   :  { %v158_v7 = vsub.f32 2.0, %v156_v6  ;;  %v161_v12 = vmul.f32 %v159_v8, %v133_v9 }
 0x1b5   :  { %v160_v11 = vmul.f32 %v216_v3, %v158_v7 }
 0x1b7   :  { %v162_v13 = vmul.f32 %v160_v11, %v140_v10 }
 0x1b9   :  { %v166_v14 = vsel %vm165_vm2, %v162_v13, %v161_v12 }
 0x1ba   :  { %169 = vst.msk [vmem:[#allocation2] sm:$0x3] %vm168_vm3, %v166_v14 }
 0x1bb   :  { %228 = shalt.err (!%p225_p4)
}
 0x1bc   :  { %s229_s28 = scalar_lea.hbm %s308_s4, 32 }
 0x1bd   :  { %p230_p5 = scmp.ne.s32.totalorder %s308_s4, %s229_s28  ;;  %p233_p6 = scmp.lt.u32.totalorder %s229_s28, %s308_s4 }
 0x1bf   :  { %p235_p7 = pnand %p233_p6, %p230_p5 }
 0x1c1   :  { %238 = shalt.err (!%p235_p7)
}
 0x1c2   :  { %179 = dma.vmem_to_hbm [thread:$0]  %s177_s3, 32, %s308_s4, [#allocation3]  }
 0x1c3   :  { %239 = dma.done.wait [#allocation3], 32  }
 0x1c4   :  { %240 = vsyncadd [#allocation3], 4294967264 }
 0x1c5   :  { %183 = vsyncpa [#allocation3], 1 }

</bundles_post_ra>
